<compile_context>
chip_gen: v7x
topology: tpu7x:2x2x1
jax: 0.10.0
libtpu: 0.0.40
codegen_flags: <defaults>
</compile_context>

<pallas_src>
import jax
import jax.numpy as jnp
from jax.experimental import pallas as pl
from jax.experimental.pallas import tpu as pltpu

# Static row offsets of each (K-padded) weight inside the packed bf16 slab.
# All offsets / extents are multiples of 16 (bf16 sublane tile).
_W1_OFF, _W1_ROWS = 0, 16      # (4   -> 16 ) x 128
_W2_OFF, _W2_ROWS = 16, 128    #  128        x 128
_W3_OFF, _W3_ROWS = 144, 128   # (64  -> 128) x 128
_W4_OFF, _W4_ROWS = 272, 128   # (32  -> 128) x 128
_W_SLAB_ROWS = 400
_X_PAD_COLS = 16               # 4 input features zero-padded to 16 lanes
_OUT_LANES = 128               # 3 logits zero-padded to 128 lanes
_ROW_ALIGN = 16                # bf16 row (sublane) packing


def _round_up(n, m):
    return ((n + m - 1) // m) * m


def iris_mlp_kernel(x_ref, w_ref, b_ref, o_ref):
    """Fused (Linear+ReLU) x3 + Linear on one (tb, 16) bf16 batch tile."""
    x = x_ref[...]                               # (tb, 16) bf16, MXU-ready
    bias = b_ref[...]                            # (8, 128) f32; rows 0..3 used

    def layer(h_bf16, w_off, w_rows, b_row, relu):
        w = w_ref[pl.ds(w_off, w_rows), :]       # static, tile-aligned slice (bf16)
        acc = jnp.dot(h_bf16, w, preferred_element_type=jnp.float32)
        acc = acc + bias[b_row:b_row + 1, :]     # bias-add in f32
        if relu:
            acc = jnp.maximum(acc, 0.0)          # ReLU in f32
        return acc

    h = layer(x, _W1_OFF, _W1_ROWS, 0, True).astype(jnp.bfloat16)
    h = layer(h, _W2_OFF, _W2_ROWS, 1, True).astype(jnp.bfloat16)
    h = layer(h, _W3_OFF, _W3_ROWS, 2, True).astype(jnp.bfloat16)
    out = layer(h, _W4_OFF, _W4_ROWS, 3, False)  # (tb, 128) f32, lane-dense
    o_ref[...] = out.astype(o_ref.dtype)         # bf16 unmasked store


def prepare_params(params):
    """Pack the 4 (W, b) pairs into one bf16 weight slab + one f32 bias slab.

    Weights arrive as (in_features, out_features). out_features is zero-padded
    to 128 lanes and in_features to the 16-row-aligned sizes above, then all
    four weights are stacked along rows. Padded bias lanes are exactly zero so
    padded output columns of every layer stay exactly zero through ReLU/matmul.
    """
    def pad2(a, rows, cols):
        assert a.ndim == 2 and a.shape[0] <= rows and a.shape[1] <= cols, a.shape
        return jnp.pad(a, ((0, rows - a.shape[0]), (0, cols - a.shape[1])))

    def as_row(b):
        b = jnp.asarray(b, jnp.float32).reshape(1, -1)   # accept (out,) or (1,out)
        return b

    (w1, b1), (w2, b2), (w3, b3), (w4, b4) = params
    w_slab = jnp.concatenate(
        [
            pad2(jnp.asarray(w1), _W1_ROWS, _OUT_LANES),
            pad2(jnp.asarray(w2), _W2_ROWS, _OUT_LANES),
            pad2(jnp.asarray(w3), _W3_ROWS, _OUT_LANES),
            pad2(jnp.asarray(w4), _W4_ROWS, _OUT_LANES),
        ],
        axis=0,
    ).astype(jnp.bfloat16)                                        # (400, 128)

    b_slab = jnp.concatenate(
        [pad2(as_row(b), 1, _OUT_LANES) for b in (b1, b2, b3, b4)]
        + [jnp.zeros((4, _OUT_LANES), jnp.float32)],
        axis=0,
    ).astype(jnp.float32)                                         # (8, 128)
    return w_slab, b_slab


def iris_net_forward(x, packed_params, *, batch_tile=4096):
    """x: (B, 4) f32 -> (B, 3) f32 logits."""
    w_slab, b_slab = packed_params
    B = x.shape[0]

    # Batch tile: multiple of 16 (bf16 sublane rows); cap at `batch_tile`.
    b_aligned = _round_up(max(B, _ROW_ALIGN), _ROW_ALIGN)
    tb = min(_round_up(batch_tile, _ROW_ALIGN), b_aligned)
    # v7x has 2 TensorCores: make sure the "parallel" grid has >= 2 steps
    # whenever the batch is large enough to split.
    if b_aligned // tb < 2 and tb >= 2 * _ROW_ALIGN:
        tb = _round_up(tb // 2, _ROW_ALIGN)
    b_pad = _round_up(b_aligned, tb)
    grid = b_pad // tb

    # Pad features 4 -> 16 lanes and batch to a tile multiple, in bf16
    # (halves the input DMA; padded rows/lanes are zero).
    x_pad = jnp.pad(
        x.astype(jnp.bfloat16),
        ((0, b_pad - B), (0, _X_PAD_COLS - x.shape[1])),
    )

    # Advisory cost estimate (padded FLOPs / bytes) for XLA's scheduler.
    flops_per_row = 2 * (_X_PAD_COLS * 128 + 128 * 128 + 128 * 128 + 128 * 128)
    cost = pl.CostEstimate(
        flops=int(flops_per_row * b_pad),
        transcendentals=0,
        bytes_accessed=int(
            b_pad * _X_PAD_COLS * 2            # x (bf16)
            + _W_SLAB_ROWS * _OUT_LANES * 2    # weight slab (bf16)
            + 8 * _OUT_LANES * 4               # bias slab (f32)
            + b_pad * _OUT_LANES * 2           # output (bf16)
        ),
    )

    out = pl.pallas_call(
        iris_mlp_kernel,
        out_shape=jax.ShapeDtypeStruct((b_pad, _OUT_LANES), jnp.bfloat16),
        grid=(grid,),
        in_specs=[
            pl.BlockSpec((tb, _X_PAD_COLS), lambda i: (i, 0)),            # x tile
            pl.BlockSpec((_W_SLAB_ROWS, _OUT_LANES), lambda i: (0, 0)),   # resident weights
            pl.BlockSpec((8, _OUT_LANES), lambda i: (0, 0)),              # resident biases
        ],
        out_specs=pl.BlockSpec((tb, _OUT_LANES), lambda i: (i, 0)),
        compiler_params=pltpu.CompilerParams(
            dimension_semantics=("parallel",),
            allow_input_fusion=[True, False, False],   # let XLA fuse the pad of x
        ),
        cost_estimate=cost,
    )(x_pad, w_slab, b_slab)

    # Slice on the bf16 slab (half the re-read vs f32), upcast the tiny result.
    return out[:B, :3].astype(jnp.float32)


def init_linear(key, in_features, out_features):
    """Deterministic init mimicking PyTorch nn.Linear defaults
    (uniform(-1/sqrt(fan_in), 1/sqrt(fan_in))). Weight stored as (in, out)."""
    kw, kb = jax.random.split(key)
    bound = 1.0 / jnp.sqrt(jnp.float32(in_features))
    w = jax.random.uniform(kw, (in_features, out_features), jnp.float32,
                           minval=-bound, maxval=bound)
    b = jax.random.uniform(kb, (1, out_features), jnp.float32,
                           minval=-bound, maxval=bound)
    return w, b


def reference_forward(x, params):
    """Plain-JAX reference with the same bf16-matmul / f32-accumulate semantics."""
    (w1, b1), (w2, b2), (w3, b3), (w4, b4) = params

    def lin(h, w, b):
        return jnp.dot(h.astype(jnp.bfloat16), w.astype(jnp.bfloat16),
                       preferred_element_type=jnp.float32) + b.reshape(1, -1)

    h = jnp.maximum(lin(x, w1, b1), 0.0)
    h = jnp.maximum(lin(h, w2, b2), 0.0)
    h = jnp.maximum(lin(h, w3, b3), 0.0)
    return lin(h, w4, b4)


if __name__ == "__main__":
    key = jax.random.PRNGKey(0)
    k_x, k1, k2, k3, k4 = jax.random.split(key, 5)

    # Small batch of iris-like features (batch=8, 4 features).
    batch = 8
    x = jax.random.normal(k_x, (batch, 4), jnp.float32)

    params = (
        init_linear(k1, 4, 128),
        init_linear(k2, 128, 64),
        init_linear(k3, 64, 32),
        init_linear(k4, 32, 3),
    )
    packed = prepare_params(params)

    out = iris_net_forward(x, packed)
    out = jax.block_until_ready(out)

    # Reference (kernel stores logits in bf16, so round the reference the same way).
    ref = reference_forward(x, params)
    ref_bf16 = ref.astype(jnp.bfloat16).astype(jnp.float32)

    assert out.shape == (batch, 3), out.shape
    assert jnp.allclose(out, ref_bf16, atol=1e-2, rtol=1e-2), "mismatch vs reference"

    print("KERNEL_OK")
</pallas_src>

<mosaic_0001>
module attributes {stable_mosaic.version = 11 : i64} {
  func.func @iris_mlp_kernel(%arg0: i32, %arg1: memref<16x16xbf16, #tpu.memory_space<vmem>>, %arg2: memref<400x128xbf16, #tpu.memory_space<vmem>>, %arg3: memref<8x128xf32, #tpu.memory_space<vmem>>, %arg4: memref<16x128xbf16, #tpu.memory_space<vmem>>) attributes {dimension_semantics = [#tpu.dimension_semantics<parallel>], iteration_bounds = array<i64: 1>, scalar_prefetch = 0 : i64, scratch_operands = 0 : i64, tpu.core_type = #tpu.core_type<tc>, window_params = [{transform_indices = @transform_0, window_bounds = array<i64: 16, 16>}, {pipeline_mode = #tpu.pipeline_mode<synchronous>, transform_indices = @transform_1, window_bounds = array<i64: 400, 128>}, {pipeline_mode = #tpu.pipeline_mode<synchronous>, transform_indices = @transform_2, window_bounds = array<i64: 8, 128>}, {transform_indices = @transform_3, window_bounds = array<i64: 16, 128>}]} {
    %c0 = arith.constant 0 : index
    %c0_0 = arith.constant 0 : index
    %0 = vector.load %arg1[%c0, %c0_0] : memref<16x16xbf16, #tpu.memory_space<vmem>>, vector<16x16xbf16>
    %c0_1 = arith.constant 0 : index
    %c0_2 = arith.constant 0 : index
    %1 = vector.load %arg3[%c0_1, %c0_2] : memref<8x128xf32, #tpu.memory_space<vmem>>, vector<8x128xf32>
    %c0_3 = arith.constant 0 : index
    %c0_4 = arith.constant 0 : index
    %2 = vector.load %arg2[%c0_3, %c0_4] : memref<400x128xbf16, #tpu.memory_space<vmem>>, vector<16x128xbf16>
    %cst = arith.constant dense<0.000000e+00> : vector<16x128xf32>
    %3 = tpu.matmul %0, %2, %cst {dimension_numbers = #tpu.dot_dimension_numbers<[1], [0], [0], [1], [0, 0, 1, 1], [], []>} : vector<16x16xbf16>, vector<16x128xbf16>, vector<16x128xf32> -> vector<16x128xf32>
    %4 = vector.extract_strided_slice %1 {offsets = [0, 0], sizes = [1, 128], strides = [1, 1]} : vector<8x128xf32> to vector<1x128xf32>
    %5 = vector.broadcast %4 : vector<1x128xf32> to vector<16x128xf32>
    %6 = arith.addf %3, %5 : vector<16x128xf32>
    %cst_5 = arith.constant 0.000000e+00 : f32
    %7 = vector.broadcast %cst_5 : f32 to vector<16x128xf32>
    %8 = arith.maximumf %6, %7 : vector<16x128xf32>
    %9 = arith.truncf %8 : vector<16x128xf32> to vector<16x128xbf16>
    %c16 = arith.constant 16 : index
    %c0_6 = arith.constant 0 : index
    %10 = vector.load %arg2[%c16, %c0_6] : memref<400x128xbf16, #tpu.memory_space<vmem>>, vector<128x128xbf16>
    %cst_7 = arith.constant dense<0.000000e+00> : vector<16x128xf32>
    %11 = tpu.matmul %9, %10, %cst_7 {dimension_numbers = #tpu.dot_dimension_numbers<[1], [0], [0], [1], [0, 0, 1, 1], [], []>} : vector<16x128xbf16>, vector<128x128xbf16>, vector<16x128xf32> -> vector<16x128xf32>
    %12 = vector.extract_strided_slice %1 {offsets = [1, 0], sizes = [1, 128], strides = [1, 1]} : vector<8x128xf32> to vector<1x128xf32>
    %13 = vector.broadcast %12 : vector<1x128xf32> to vector<16x128xf32>
    %14 = arith.addf %11, %13 : vector<16x128xf32>
    %cst_8 = arith.constant 0.000000e+00 : f32
    %15 = vector.broadcast %cst_8 : f32 to vector<16x128xf32>
    %16 = arith.maximumf %14, %15 : vector<16x128xf32>
    %17 = arith.truncf %16 : vector<16x128xf32> to vector<16x128xbf16>
    %c144 = arith.constant 144 : index
    %c0_9 = arith.constant 0 : index
    %18 = vector.load %arg2[%c144, %c0_9] : memref<400x128xbf16, #tpu.memory_space<vmem>>, vector<128x128xbf16>
    %cst_10 = arith.constant dense<0.000000e+00> : vector<16x128xf32>
    %19 = tpu.matmul %17, %18, %cst_10 {dimension_numbers = #tpu.dot_dimension_numbers<[1], [0], [0], [1], [0, 0, 1, 1], [], []>} : vector<16x128xbf16>, vector<128x128xbf16>, vector<16x128xf32> -> vector<16x128xf32>
    %20 = vector.extract_strided_slice %1 {offsets = [2, 0], sizes = [1, 128], strides = [1, 1]} : vector<8x128xf32> to vector<1x128xf32>
    %21 = vector.broadcast %20 : vector<1x128xf32> to vector<16x128xf32>
    %22 = arith.addf %19, %21 : vector<16x128xf32>
    %cst_11 = arith.constant 0.000000e+00 : f32
    %23 = vector.broadcast %cst_11 : f32 to vector<16x128xf32>
    %24 = arith.maximumf %22, %23 : vector<16x128xf32>
    %25 = arith.truncf %24 : vector<16x128xf32> to vector<16x128xbf16>
    %c272 = arith.constant 272 : index
    %c0_12 = arith.constant 0 : index
    %26 = vector.load %arg2[%c272, %c0_12] : memref<400x128xbf16, #tpu.memory_space<vmem>>, vector<128x128xbf16>
    %cst_13 = arith.constant dense<0.000000e+00> : vector<16x128xf32>
    %27 = tpu.matmul %25, %26, %cst_13 {dimension_numbers = #tpu.dot_dimension_numbers<[1], [0], [0], [1], [0, 0, 1, 1], [], []>} : vector<16x128xbf16>, vector<128x128xbf16>, vector<16x128xf32> -> vector<16x128xf32>
    %28 = vector.extract_strided_slice %1 {offsets = [3, 0], sizes = [1, 128], strides = [1, 1]} : vector<8x128xf32> to vector<1x128xf32>
    %29 = vector.broadcast %28 : vector<1x128xf32> to vector<16x128xf32>
    %30 = arith.addf %27, %29 : vector<16x128xf32>
    %31 = arith.truncf %30 : vector<16x128xf32> to vector<16x128xbf16>
    %c0_14 = arith.constant 0 : index
    %c0_15 = arith.constant 0 : index
    %32 = vector.load %arg4[%c0_14, %c0_15] : memref<16x128xbf16, #tpu.memory_space<vmem>>, vector<16x128xbf16>
    tpu.vector_store %arg4[%c0_14, %c0_15], %31 {strides = array<i32>} : memref<16x128xbf16, #tpu.memory_space<vmem>>, vector<16x128xbf16>,
    return
  }
  func.func @transform_0(%arg0: i32) -> (i32, i32) {
    %c0_i32 = arith.constant 0 : i32
    %c0_i32_0 = arith.constant 0 : i32
    return %arg0, %c0_i32 : i32, i32
  }
  func.func @transform_1(%arg0: i32) -> (i32, i32) {
    %c0_i32 = arith.constant 0 : i32
    %c0_i32_0 = arith.constant 0 : i32
    %c0_i32_1 = arith.constant 0 : i32
    return %c0_i32, %c0_i32_0 : i32, i32
  }
  func.func @transform_2(%arg0: i32) -> (i32, i32) {
    %c0_i32 = arith.constant 0 : i32
    %c0_i32_0 = arith.constant 0 : i32
    %c0_i32_1 = arith.constant 0 : i32
    return %c0_i32, %c0_i32_0 : i32, i32
  }
  func.func @transform_3(%arg0: i32) -> (i32, i32) {
    %c0_i32 = arith.constant 0 : i32
    %c0_i32_0 = arith.constant 0 : i32
    return %arg0, %c0_i32 : i32, i32
  }
}

</mosaic_0001>

<bundles_post_ra>
// kernel: tpu_custom_call.1
= control target key start
LH: loop header
LB: loop body
LE: loop exit
PB: predicated region body
PF: predicated region fallthrough
CT: control target
= control target key end

     0   :  { %8 = vsyncpa [#allocation3], 0  ;;  %s880_s0 = inlined_call_operand.hbm [shape: bf16[16,16], index: 0, kind: input, shape index: {}]   ;;  %s881_s1 = inlined_call_operand.hbm [shape: bf16[400,128], index: 1, kind: input, shape index: {}]   ;;  %s882_s2 = inlined_call_operand.hbm [shape: f32[8,128], index: 2, kind: input, shape index: {}]   ;;  %s883_s3 = inlined_call_operand.hbm [shape: bf16[16,128], index: 3, kind: output, shape index: {}]  }
   0x1   :  { %9 = vsyncpa [#allocation6], 0 }
   0x2   :  { %10 = vsyncpa [#allocation4], 0  ;;  %s743_s12 = smov [#allocation5]   ;;  %s744_s14 = smov [#allocation2]  }
   0x3   :  { %s28_s13 = sshll.u32 %s743_s12, 4  ;;  %s16_s15 = sshll.u32 %s744_s14, 4  ;;  %s29_s13 = int_to_ptr.vmem [resolvable:$true] %s28_s13  ;;  %s771_s15 = int_to_ptr.vmem [resolvable:$true] %s16_s15 }
   0x4   :  { %s649_s18 = scalar_lea.hbm %s881_s1, 3200 }
   0x5   :  { %p650_p0 = scmp.ne.s32.totalorder %s881_s1, %s649_s18  ;;  %p653_p1 = scmp.lt.u32.totalorder %s649_s18, %s881_s1 }
   0x7   :  { %p655_p2 = pnand %p653_p1, %p650_p0 }
   0x9   :  { %658 = shalt.err (!%p655_p2)
}
   0xa   :  { %s659_s23 = scalar_lea.vmem %s29_s13, 3200  ;;  %p664_p4 = scmp.lt.s32.totalorder %s29_s13, %s29_s13 }
   0xb   :  { %p660_p3 = scmp.ne.s32.totalorder %s29_s13, %s659_s23  ;;  %p665_p5 = scmp.lt.s32.totalorder %s659_s23, %s659_s23 }
   0xd   :  { %p666_p6 = por %p665_p5, %p664_p4 }
   0xf   :  { %p667_p7 = pnand %p666_p6, %p660_p3 }
  0x11   :  { %670 = shalt.err (!%p667_p7)
}
  0x12   :  { %s745_s24 = smov 64   ;;  %s746_s25 = smov 4  }
  0x13   :  { %34 = dma.hbm_to_vmem [thread:$0]  %s881_s1, 3200, %s29_s13, [#allocation6], %s745_s24, %s745_s24, %s746_s25  }
  0x14   :  { %s671_s30 = scalar_lea.hbm %s880_s0, 128 }
  0x15   :  { %p672_p8 = scmp.ne.s32.totalorder %s880_s0, %s671_s30  ;;  %p675_p9 = scmp.lt.u32.totalorder %s671_s30, %s880_s0 }
  0x17   :  { %p677_p10 = pnand %p675_p9, %p672_p8 }
  0x19   :  { %680 = shalt.err (!%p677_p10)
}
  0x1a   :  { %s681_s8 = scalar_lea.vmem %s771_s15, 128  ;;  %p686_p12 = scmp.lt.s32.totalorder %s771_s15, %s771_s15 }
  0x1b   :  { %p682_p11 = scmp.ne.s32.totalorder %s771_s15, %s681_s8  ;;  %p687_p13 = scmp.lt.s32.totalorder %s681_s8, %s681_s8 }
  0x1d   :  { %p688_p0 = por %p687_p13, %p686_p12 }
  0x1f   :  { %p689_p1 = pnand %p688_p0, %p682_p11 }
  0x21   :  { %692 = shalt.err (!%p689_p1)
}
  0x22   :  { %22 = dma.hbm_to_vmem [thread:$0]  %s880_s0, 128, %s771_s15, [#allocation3], %s745_s24, %s745_s24, %s746_s25  }
  0x23   :  { %s747_s10 = smov [#allocation7]   ;;  %s693_s14 = scalar_lea.hbm %s882_s2, 128 }
  0x24   :  { %s41_s11 = sshll.u32 %s747_s10, 4  ;;  %p694_p2 = scmp.ne.s32.totalorder %s882_s2, %s693_s14  ;;  %s42_s11 = int_to_ptr.vmem [resolvable:$true] %s41_s11 }
  0x25   :  { %p697_p3 = scmp.lt.u32.totalorder %s693_s14, %s882_s2 }
  0x27   :  { %p699_p4 = pnand %p697_p3, %p694_p2 }
  0x29   :  { %702 = shalt.err (!%p699_p4)
}
  0x2a   :  { %s703_s20 = scalar_lea.vmem %s42_s11, 128  ;;  %p708_p6 = scmp.lt.s32.totalorder %s42_s11, %s42_s11 }
  0x2b   :  { %p704_p5 = scmp.ne.s32.totalorder %s42_s11, %s703_s20  ;;  %p709_p7 = scmp.lt.s32.totalorder %s703_s20, %s703_s20 }
  0x2d   :  { %p710_p8 = por %p709_p7, %p708_p6 }
  0x2f   :  { %p711_p9 = pnand %p710_p8, %p704_p5 }
  0x31   :  { %714 = shalt.err (!%p711_p9)
}
  0x32   :  { %44 = dma.hbm_to_vmem [thread:$0]  %s882_s2, 128, %s42_s11, [#allocation6]  }
  0x33   :  { %737 = dma.done.wait [#allocation3], 128  }
  0x34   :  { %738 = vsyncadd [#allocation3], 4294967168 }
  0x35   :  { %739 = dma.done.wait [#allocation6], 3328  }
  0x36   :  { %740 = vsyncadd [#allocation6], 4294963968  ;;  %v748_v0 = vmov 0.0   ;;  %vm749_vm0 = vmmov 0   ;;  %v623_v1 = vld [vmem:[#allocation5] sm:$0xff]   ;;  %v624_v2 = vld [vmem:[#allocation2] sm:$0xff]   ;;  %v60_v17 = vlaneseq }
  0x37   :  { %549 = vmatprep.subr.bf16.mxu0 %v748_v0  ;;  %551 = vmatprep.mubr.msk.bf16.mxu0 %vm749_vm0, %v748_v0  ;;  %vm75_vm1 = vcmask 130048   ;;  %v625_v3 = vld [vmem:[#allocation5 + $0x8] sm:$0xff]   ;;  %v626_v4 = vld [vmem:[#allocation5 + $0x10] sm:$0xff]   ;;  %v627_v5 = vld [vmem:[#allocation5 + $0x18] sm:$0xff]   ;;  %s750_s2 = smov [#allocation8]  }
  0x38   :  { %555 = vmatprep.subr.bf16.mxu1 %v748_v0  ;;  %571 = vmatprep.mubr.msk.bf16.mxu1 %vm749_vm0, %v748_v0  ;;  %v628_v6 = vld [vmem:[#allocation5 + $0x20] sm:$0xff]   ;;  %v629_v7 = vld [vmem:[#allocation5 + $0x28] sm:$0xff]   ;;  %v630_v8 = vld [vmem:[#allocation5 + $0x30] sm:$0xff]   ;;  %v843_v18 = vshrl.u32 %v60_v17, 7  ;;  %s471_s21 = sshll.u32 %s750_s2, 4  ;;  %s472_s21 = int_to_ptr.vmem [resolvable:$true] %s471_s21 }
  0x39   :  { %550 = vmatpush3.bf16.msra.mxu0 %v623_v1  ;;  %556 = vmatpush3.bf16.msra.mxu1 %v625_v3  ;;  %v631_v9 = vld [vmem:[#allocation5 + $0x38] sm:$0xff]   ;;  %v632_v10 = vld [vmem:[#allocation5 + $0x40] sm:$0xff]   ;;  %v633_v11 = vld [vmem:[#allocation5 + $0x48] sm:$0xff]   ;;  %s715_s22 = scalar_lea.vmem %s472_s21, 128  ;;  %p720_p11 = scmp.lt.s32.totalorder %s472_s21, %s472_s21 }
  0x3a   :  { %575 = vmatprep.subr.bf16.mxu0 %v748_v0  ;;  %557 = vmatprep.subr.bf16.mxu1 %v748_v0  ;;  %v634_v12 = vld [vmem:[#allocation5 + $0x50] sm:$0xff]   ;;  %v635_v13 = vld [vmem:[#allocation5 + $0x58] sm:$0xff]   ;;  %v636_v14 = vld [vmem:[#allocation5 + $0x60] sm:$0xff]   ;;  %v62_v19 = vsub.s32 0, %v843_v18  ;;  %v141_v39 = vsub.s32 1, %v843_v18  ;;  %v253_v52 = vsub.s32 2, %v843_v18  ;;  %p716_p10 = scmp.ne.s32.totalorder %s472_s21, %s715_s22  ;;  %p721_p12 = scmp.lt.s32.totalorder %s715_s22, %s715_s22 }
  0x3b   :  { %v637_v15 = vld [vmem:[#allocation5 + $0x68] sm:$0xff]   ;;  %v638_v16 = vld [vmem:[#allocation5 + $0x70] sm:$0xff]   ;;  %v639_v31 = vld [vmem:[#allocation5 + $0x78] sm:$0xff]   ;;  %v365_v63 = vsub.s32 3, %v843_v18 }
  0x3c   :  { %552 = vmatmul.mubr.msk.bf16.vlgmr.msra.gmra.mrb[0].mxu0 %vm75_vm1, %v624_v2  ;;  %v846_v20 = vld [vmem:[#allocation7] sm:$0xff]  ;;  %v640_v32 = vld [vmem:[#allocation5 + $0x80] sm:$0xff]   ;;  %v642_v34 = vld [vmem:[#allocation5 + $0x90] sm:$0xff]   ;;  %p722_p13 = por %p721_p12, %p720_p11 }
  0x3d   :  { %591 = vmatprep.mubr.msk.bf16.mxu0 %vm749_vm0, %v748_v0  ;;  %558 = vmatpush3.bf16.msra.mxu1 %v626_v4  ;;  %v63_v21 = vrot.slane %v846_v20, %v62_v19  ;;  %v641_v33 = vld [vmem:[#allocation5 + $0x88] sm:$0xff]   ;;  %v643_v35 = vld [vmem:[#allocation5 + $0x98] sm:$0xff]   ;;  %v644_v36 = vld [vmem:[#allocation5 + $0xa0] sm:$0xff]   ;;  %v142_v40 = vrot.slane %v846_v20, %v141_v39  ;;  %v254_v53 = vrot.slane %v846_v20, %v253_v52 }
  0x3e   :  { %559 = vmatprep.subr.bf16.mxu1 %v748_v0  ;;  %576 = vmatpush3.bf16.msra.mxu0 %v633_v11  ;;  %v645_v37 = vld [vmem:[#allocation5 + $0xa8] sm:$0xff]   ;;  %v646_v38 = vld [vmem:[#allocation5 + $0xb0] sm:$0xff]   ;;  %v647_v50 = vld [vmem:[#allocation5 + $0xb8] sm:$0xff]   ;;  %p723_p0 = pnand %p722_p13, %p716_p10 }
  0x3f   :  { %577 = vmatprep.subr.bf16.mxu0 %v748_v0  ;;  %v648_v51 = vld [vmem:[#allocation5 + $0xc0] sm:$0xff]  }
  0x41   :  { %560 = vmatpush3.bf16.msra.mxu1 %v627_v5 }
  0x42   :  { %561 = vmatprep.subr.bf16.mxu1 %v748_v0  ;;  %578 = vmatpush3.bf16.msra.mxu0 %v634_v12 }
  0x43   :  { %579 = vmatprep.subr.bf16.mxu0 %v748_v0 }
  0x45   :  { %562 = vmatpush3.bf16.msra.mxu1 %v628_v6 }
  0x46   :  { %563 = vmatprep.subr.bf16.mxu1 %v748_v0  ;;  %580 = vmatpush3.bf16.msra.mxu0 %v635_v13 }
  0x47   :  { %581 = vmatprep.subr.bf16.mxu0 %v748_v0 }
  0x49   :  { %564 = vmatpush3.bf16.msra.mxu1 %v629_v7 }
  0x4a   :  { %565 = vmatprep.subr.bf16.mxu1 %v748_v0  ;;  %582 = vmatpush3.bf16.msra.mxu0 %v636_v14 }
  0x4b   :  { %583 = vmatprep.subr.bf16.mxu0 %v748_v0 }
  0x4d   :  { %566 = vmatpush3.bf16.msra.mxu1 %v630_v8 }
  0x4e   :  { %567 = vmatprep.subr.bf16.mxu1 %v748_v0  ;;  %584 = vmatpush3.bf16.msra.mxu0 %v637_v15 }
  0x4f   :  { %585 = vmatprep.subr.bf16.mxu0 %v748_v0 }
  0x51   :  { %568 = vmatpush3.bf16.msra.mxu1 %v631_v9 }
  0x52   :  { %569 = vmatprep.subr.bf16.mxu1 %v748_v0  ;;  %586 = vmatpush3.bf16.msra.mxu0 %v638_v16 }
  0x53   :  { %587 = vmatprep.subr.bf16.mxu0 %v748_v0 }
  0x55   :  { %570 = vmatpush3.bf16.msra.mxu1 %v632_v10 }
  0x56   :  { %595 = vmatprep.subr.bf16.mxu1 %v748_v0  ;;  %588 = vmatpush3.bf16.msra.mxu0 %v639_v31 }
  0x57   :  { %589 = vmatprep.subr.bf16.mxu0 %v748_v0 }
  0x5a   :  { %590 = vmatpush3.bf16.msra.mxu0 %v640_v32 }
 0x10f   :  { %v113_v22 = vpop.f32.mrb[0].mxu0 }
 0x110   :  { %v114_v23 = vadd.f32 %v113_v22, %v63_v21  ;;  %v553_v24 = vpop.f32.mrb[1].mxu0 }
 0x111   :  { %v116_v25 = vpop.f32.mrb[2].mxu0 }
 0x112   :  { %v117_v26 = vadd.f32 %v116_v25, %v63_v21  ;;  %v554_v27 = vpop.f32.mrb[3].mxu0  ;;  %v120_v28 = vmax.f32 %v114_v23, 0.0 }
 0x114   :  { %v121_v29 = vmax.f32 %v117_v26, 0.0 }
 0x116   :  { %v122_v30 = vpack.c.bf16 %v121_v29, %v120_v28 }
 0x118   :  { %572 = vmatmul.mubr.bf16.vlgmr.msra.gmra.mrb[0].mxu1 %v122_v30 }
 0x119   :  { %611 = vmatprep.mubr.msk.bf16.mxu1 %vm749_vm0, %v748_v0  ;;  %596 = vmatpush3.bf16.msra.mxu1 %v641_v33 }
 0x11a   :  { %597 = vmatprep.subr.bf16.mxu1 %v748_v0 }
 0x11d   :  { %598 = vmatpush3.bf16.msra.mxu1 %v642_v34 }
 0x11e   :  { %599 = vmatprep.subr.bf16.mxu1 %v748_v0 }
 0x121   :  { %600 = vmatpush3.bf16.msra.mxu1 %v643_v35 }
 0x122   :  { %601 = vmatprep.subr.bf16.mxu1 %v748_v0 }
 0x125   :  { %602 = vmatpush3.bf16.msra.mxu1 %v644_v36 }
 0x126   :  { %603 = vmatprep.subr.bf16.mxu1 %v748_v0 }
 0x129   :  { %604 = vmatpush3.bf16.msra.mxu1 %v645_v37 }
 0x12a   :  { %605 = vmatprep.subr.bf16.mxu1 %v748_v0 }
 0x12d   :  { %606 = vmatpush3.bf16.msra.mxu1 %v646_v38 }
 0x12e   :  { %607 = vmatprep.subr.bf16.mxu1 %v748_v0 }
 0x131   :  { %608 = vmatpush3.bf16.msra.mxu1 %v647_v50 }
 0x132   :  { %609 = vmatprep.subr.bf16.mxu1 %v748_v0  ;;  %v366_v0 = vrot.slane %v846_v20, %v365_v63 }
 0x135   :  { %610 = vmatpush3.bf16.msra.mxu1 %v648_v51 }
 0x1eb   :  { %v225_v41 = vpop.f32.mrb[0].mxu1 }
 0x1ec   :  { %v226_v42 = vadd.f32 %v225_v41, %v142_v40  ;;  %v573_v43 = vpop.f32.mrb[1].mxu1 }
 0x1ed   :  { %v228_v44 = vpop.f32.mrb[2].mxu1 }
 0x1ee   :  { %v229_v45 = vadd.f32 %v228_v44, %v142_v40  ;;  %v574_v46 = vpop.f32.mrb[3].mxu1  ;;  %v232_v47 = vmax.f32 %v226_v42, 0.0 }
 0x1f0   :  { %v233_v48 = vmax.f32 %v229_v45, 0.0 }
 0x1f2   :  { %v234_v49 = vpack.c.bf16 %v233_v48, %v232_v47 }
 0x1f4   :  { %592 = vmatmul.mubr.bf16.vlgmr.msra.gmra.mrb[4].mxu0 %v234_v49 }
 0x2c7   :  { %v337_v54 = vpop.f32.mrb[4].mxu0 }
 0x2c8   :  { %v338_v55 = vadd.f32 %v337_v54, %v254_v53  ;;  %v593_v56 = vpop.f32.mrb[5].mxu0 }
 0x2c9   :  { %v340_v57 = vpop.f32.mrb[6].mxu0 }
 0x2ca   :  { %v341_v58 = vadd.f32 %v340_v57, %v254_v53  ;;  %v594_v59 = vpop.f32.mrb[7].mxu0  ;;  %v344_v60 = vmax.f32 %v338_v55, 0.0 }
 0x2cc   :  { %v345_v61 = vmax.f32 %v341_v58, 0.0 }
 0x2ce   :  { %v346_v62 = vpack.c.bf16 %v345_v61, %v344_v60 }
 0x2d0   :  { %612 = vmatmul.mubr.bf16.vlgmr.msra.gmra.mrb[4].mxu1 %v346_v62 }
 0x3a3   :  { %v449_v1 = vpop.f32.mrb[4].mxu1 }
 0x3a4   :  { %v613_v2 = vpop.f32.mrb[5].mxu1  ;;  %v450_v4 = vadd.f32 %v449_v1, %v366_v0 }
 0x3a5   :  { %v452_v3 = vpop.f32.mrb[6].mxu1 }
 0x3a6   :  { %v453_v5 = vadd.f32 %v452_v3, %v366_v0  ;;  %v614_v6 = vpop.f32.mrb[7].mxu1 }
 0x3a8   :  { %v518_v7 = vpack.c.bf16 %v453_v5, %v450_v4 }
 0x3aa   :  { %519 = vst [vmem:[#allocation8] sm:$0xff] %v518_v7  }
 0x3ab   :  { %726 = shalt.err (!%p723_p0)
}
 0x3ac   :  { %s727_s27 = scalar_lea.hbm %s883_s3, 128 }
 0x3ad   :  { %p728_p1 = scmp.ne.s32.totalorder %s883_s3, %s727_s27  ;;  %p731_p2 = scmp.lt.u32.totalorder %s727_s27, %s883_s3 }
 0x3af   :  { %p733_p3 = pnand %p731_p2, %p728_p1 }
 0x3b1   :  { %736 = shalt.err (!%p733_p3)
}
 0x3b2   :  { %477 = dma.vmem_to_hbm [thread:$0]  %s472_s21, 128, %s883_s3, [#allocation4], %s745_s24, %s745_s24, %s746_s25  }
 0x3b3   :  { %741 = dma.done.wait [#allocation4], 128  }
 0x3b4   :  { %742 = vsyncadd [#allocation4], 4294967168 }
 0x3b5   :  { %481 = vsyncpa [#allocation3], 1 }
 0x3b6   :  { %482 = vsyncpa [#allocation6], 1 }
 0x3b7   :  { %483 = vsyncpa [#allocation4], 1 }

</bundles_post_ra>
